<compile_context>
chip_gen: v6e
topology: v6e:2x2x1
jax: 0.10.0
libtpu: 0.0.40
codegen_flags: <defaults>
</compile_context>

<pallas_src>
import functools

import jax
import jax.numpy as jnp
from jax import lax
from jax.experimental import pallas as pl
from jax.experimental.pallas import tpu as pltpu

LANES = 128
BLOCK_BYTES = 4 * 1024 * 1024      # per-input HBM block per grid step (4 MiB)
INNER_ROWS = 512                   # rows per in-kernel compute chunk (256 KiB f32)
VMEM_LIMIT = 32 * 1024 * 1024      # explicit scoped-VMEM limit; safe on v5e..v7x


def _round_up(a, b):
    return -(-a // b) * b


def _num_tensorcores():
    """Best-effort TensorCores-per-chip: 2 on megacore-style chips, else 1.

    Any value in {1, 2} is functionally correct (extra cores only add masked,
    zero-contribution blocks), so a safe default of 1 is fine.
    """
    try:
        info = pltpu.get_tpu_info()
        for attr in ("num_cores", "core_count", "num_tensorcores",
                     "tensorcores_per_chip"):
            v = getattr(info, attr, None)
            if isinstance(v, int) and v >= 1:
                return max(1, min(int(v), 2))
    except Exception:
        pass
    try:
        kind = jax.devices()[0].device_kind.lower()
        if "v7" in kind or "v4" in kind:
            return 2
    except Exception:
        pass
    return 1


def _mse_kernel(x_ref, y_ref, o_ref, acc_ref, *,
                rows_valid, blocks_per_core, tm, inner):
    core = pl.program_id(0)
    j = pl.program_id(1)
    n_inner = tm // inner           # static

    @pl.when(j == 0)
    def _():
        acc_ref[...] = jnp.zeros_like(acc_ref)

    # Global row index of the first row of this block (UNCLAMPED: used both to
    # detect fully-valid blocks and to zero clamped / partial ones).
    row_start = (core * blocks_per_core + j) * tm
    block_full = row_start + tm <= rows_valid

    def chunk_accumulate(i, masked):
        r0 = pl.multiple_of(i * inner, inner)
        d = (x_ref[pl.ds(r0, inner), :].astype(jnp.float32)
             - y_ref[pl.ds(r0, inner), :].astype(jnp.float32))
        if masked:
            row_idx = (lax.broadcasted_iota(jnp.int32, (inner, LANES), 0)
                       + (row_start + i * inner))
            d = jnp.where(row_idx < rows_valid, d, 0.0)   # mask before squaring
        sq = d * d
        # Pure vreg-wise fold of `inner` rows into the resident (8,128) acc;
        # the cross-lane reduce happens once, in the wrapper.
        acc_ref[...] += jnp.sum(sq.reshape(inner // 8, 8, LANES), axis=0)

    @pl.when(block_full)                      # hot path: no iota/compare/select
    def _():
        @pl.loop(0, n_inner)
        def _(i):
            chunk_accumulate(i, masked=False)

    @pl.when(jnp.logical_not(block_full))     # at most one block per core
    def _():
        @pl.loop(0, n_inner)
        def _(i):
            chunk_accumulate(i, masked=True)

    @pl.when(j == pl.num_programs(1) - 1)
    def _():
        o_ref[...] = acc_ref[...]


def mse_loss(x, x_hat):
    assert x.shape == x_hat.shape, (x.shape, x_hat.shape)
    n_elems = int(x.size)

    out_dtype = jnp.result_type(x.dtype, x_hat.dtype)
    if not jnp.issubdtype(out_dtype, jnp.floating):
        out_dtype = jnp.float32

    if n_elems == 0:
        # F.mse_loss over an empty tensor is NaN in PyTorch.
        return jnp.array(jnp.nan, dtype=out_dtype)

    xf = jnp.ravel(x)
    yf = jnp.ravel(x_hat)

    rows = n_elems // LANES
    n_main = rows * LANES
    tail = n_elems - n_main

    # Ragged <128-element tail handled in plain JAX: no full-array pad/copy for
    # the (common) 128-aligned case.
    if tail:
        tail_sq = jnp.sum(
            (xf[n_main:].astype(jnp.float32) - yf[n_main:].astype(jnp.float32)) ** 2)
        # TODO(synk): a 1-D BlockSpec over the raw flat array would avoid this
        # main-slab slice copy for non-128-multiple sizes as well.
        xf = xf[:n_main]
        yf = yf[:n_main]
    else:
        tail_sq = jnp.float32(0.0)

    if rows == 0:   # whole input is smaller than one lane row
        return (tail_sq / jnp.float32(n_elems)).astype(out_dtype)

    x2d = xf.reshape(rows, LANES)   # zero-copy when n_elems % 128 == 0
    y2d = yf.reshape(rows, LANES)

    # --- tiling: bytes budget -> rows per block; chunked inner compute ---
    itemsize = max(jnp.dtype(x.dtype).itemsize, jnp.dtype(x_hat.dtype).itemsize)
    tm_cap = max(8, BLOCK_BYTES // (LANES * itemsize))   # f32:8192 bf16:16384 ...
    tm = min(tm_cap, _round_up(rows, 8))
    inner = min(INNER_ROWS, tm)
    tm = _round_up(tm, inner)                            # ensure tm % inner == 0

    n_row_blocks = -(-rows // tm)
    n_cores = _num_tensorcores()
    blocks_per_core = -(-n_row_blocks // n_cores)
    grid = (n_cores, blocks_per_core)

    # Clamp the block index so every DMA stays in bounds; clamped (duplicate)
    # blocks are zeroed by the in-kernel mask, which uses the unclamped index.
    # When n_cores == 1 the clamp is a no-op (no duplicate DMA).
    def in_map(c, j):
        return (jnp.minimum(c * blocks_per_core + j, n_row_blocks - 1), 0)

    kernel = functools.partial(
        _mse_kernel,
        rows_valid=rows,
        blocks_per_core=blocks_per_core,
        tm=tm,
        inner=inner,
    )

    partials = pl.pallas_call(
        kernel,
        out_shape=jax.ShapeDtypeStruct((n_cores, 8, LANES), jnp.float32),
        grid_spec=pltpu.PrefetchScalarGridSpec(
            num_scalar_prefetch=0,
            grid=grid,
            in_specs=[
                pl.BlockSpec((tm, LANES), in_map),
                pl.BlockSpec((tm, LANES), in_map),
            ],
            out_specs=pl.BlockSpec((None, 8, LANES), lambda c, j: (c, 0, 0)),
            scratch_shapes=[pltpu.VMEM((8, LANES), jnp.float32)],
        ),
        compiler_params=pltpu.CompilerParams(
            dimension_semantics=("parallel", "arbitrary"),
            vmem_limit_bytes=VMEM_LIMIT,
        ),
        cost_estimate=pl.CostEstimate(
            flops=3 * n_main,
            transcendentals=0,
            bytes_accessed=int(x2d.nbytes) + int(y2d.nbytes)
            + n_cores * 8 * LANES * 4,
        ),
    )(x2d, y2d)

    # Tiny final cross-lane reduce + mean in the wrapper (n_cores*8*128 values).
    total = jnp.sum(partials) + tail_sq
    return (total / jnp.float32(n_elems)).astype(out_dtype)


if __name__ == "__main__":
    key = jax.random.PRNGKey(0)
    k1, k2 = jax.random.split(key)
    # small shapes consistent with the module's forward (any matching X, X_hat)
    X = jax.random.normal(k1, (2, 4, 16, 16), dtype=jnp.float32)
    X_hat = jax.random.normal(k2, (2, 4, 16, 16), dtype=jnp.float32)

    loss = mse_loss(X, X_hat)
    jax.block_until_ready(loss)

    # sanity check against plain-JAX reference
    ref = jnp.mean((X - X_hat) ** 2)
    assert jnp.allclose(loss, ref, rtol=1e-6, atol=1e-6), (loss, ref)

    print("KERNEL_OK")
</pallas_src>

<mosaic_0001>
module attributes {stable_mosaic.version = 11 : i64} {
  func.func @_mse_kernel(%arg0: i32, %arg1: i32, %arg2: memref<16x128xf32, #tpu.memory_space<vmem>>, %arg3: memref<16x128xf32, #tpu.memory_space<vmem>>, %arg4: memref<1x8x128xf32, #tpu.memory_space<vmem>>, %arg5: memref<8x128xf32, #tpu.memory_space<vmem>>) attributes {dimension_semantics = [#tpu.dimension_semantics<parallel>, #tpu.dimension_semantics<arbitrary>], iteration_bounds = array<i64: 1, 1>, scalar_prefetch = 0 : i64, scratch_operands = 1 : i64, tpu.core_type = #tpu.core_type<tc>, window_params = [{transform_indices = @transform_0, window_bounds = array<i64: 16, 128>}, {transform_indices = @transform_1, window_bounds = array<i64: 16, 128>}, {transform_indices = @transform_2, window_bounds = array<i64: 1, 8, 128>}]} {
    %c0_i32 = arith.constant 0 : i32
    %0 = arith.cmpi eq, %arg1, %c0_i32 : i32
    %1 = arith.extui %0 : i1 to i32
    %c0_i32_0 = arith.constant 0 : i32
    %2 = arith.cmpi ne, %1, %c0_i32_0 : i32
    scf.if %2 {
      %cst = arith.constant 0.000000e+00 : f32
      %16 = vector.broadcast %cst : f32 to vector<8x128xf32>
      %c0 = arith.constant 0 : index
      %c0_7 = arith.constant 0 : index
      %17 = vector.load %arg5[%c0, %c0_7] : memref<8x128xf32, #tpu.memory_space<vmem>>, vector<8x128xf32>
      tpu.vector_store %arg5[%c0, %c0_7], %16 {strides = array<i32>} : memref<8x128xf32, #tpu.memory_space<vmem>>, vector<8x128xf32>,
    } else {
    }
    %c1_i32 = arith.constant 1 : i32
    %3 = arith.muli %arg0, %c1_i32 : i32
    %4 = arith.addi %3, %arg1 : i32
    %c16_i32 = arith.constant 16 : i32
    %5 = arith.muli %4, %c16_i32 : i32
    %c16_i32_1 = arith.constant 16 : i32
    %6 = arith.addi %5, %c16_i32_1 : i32
    %c16_i32_2 = arith.constant 16 : i32
    %7 = arith.cmpi sle, %6, %c16_i32_2 : i32
    %8 = arith.extui %7 : i1 to i32
    %c0_i32_3 = arith.constant 0 : i32
    %9 = arith.cmpi ne, %8, %c0_i32_3 : i32
    scf.if %9 {
      %c0_i32_7 = arith.constant 0 : i32
      %c1_i32_8 = arith.constant 1 : i32
      %16 = arith.muli %c0_i32_7, %c1_i32_8 : i32
      %c0_i32_9 = arith.constant 0 : i32
      %17 = arith.addi %c0_i32_9, %16 : i32
      %c16_i32_10 = arith.constant 16 : i32
      %18 = arith.muli %17, %c16_i32_10 : i32
      %19 = tpu.assume_multiple %18, 16 : i32
      %20 = arith.index_cast %19 : i32 to index
      %c0 = arith.constant 0 : index
      %21 = vector.load %arg2[%20, %c0] : memref<16x128xf32, #tpu.memory_space<vmem>>, vector<16x128xf32>
      %22 = arith.index_cast %19 : i32 to index
      %c0_11 = arith.constant 0 : index
      %23 = vector.load %arg3[%22, %c0_11] : memref<16x128xf32, #tpu.memory_space<vmem>>, vector<16x128xf32>
      %24 = arith.subf %21, %23 : vector<16x128xf32>
      %25 = arith.mulf %24, %24 : vector<16x128xf32>
      %c0_12 = arith.constant 0 : index
      %c0_13 = arith.constant 0 : index
      %26 = vector.load %arg5[%c0_12, %c0_13] : memref<8x128xf32, #tpu.memory_space<vmem>>, vector<8x128xf32>
      %27 = vector.shape_cast %25 : vector<16x128xf32> to vector<2x8x128xf32>
      %cst = arith.constant dense<0.000000e+00> : vector<8x128xf32>
      %28 = vector.multi_reduction <add>, %27, %cst [0] : vector<2x8x128xf32> to vector<8x128xf32>
      %29 = arith.addf %26, %28 : vector<8x128xf32>
      %c0_14 = arith.constant 0 : index
      %c0_15 = arith.constant 0 : index
      %30 = vector.load %arg5[%c0_14, %c0_15] : memref<8x128xf32, #tpu.memory_space<vmem>>, vector<8x128xf32>
      tpu.vector_store %arg5[%c0_14, %c0_15], %29 {strides = array<i32>} : memref<8x128xf32, #tpu.memory_space<vmem>>, vector<8x128xf32>,
      %c1_i32_16 = arith.constant 1 : i32
    } else {
    }
    %true = arith.constant true
    %10 = arith.xori %7, %true : i1
    %11 = arith.extui %10 : i1 to i32
    %c0_i32_4 = arith.constant 0 : i32
    %12 = arith.cmpi ne, %11, %c0_i32_4 : i32
    scf.if %12 {
      %c0_i32_7 = arith.constant 0 : i32
      %c1_i32_8 = arith.constant 1 : i32
      %16 = arith.muli %c0_i32_7, %c1_i32_8 : i32
      %c0_i32_9 = arith.constant 0 : i32
      %17 = arith.addi %c0_i32_9, %16 : i32
      %c16_i32_10 = arith.constant 16 : i32
      %18 = arith.muli %17, %c16_i32_10 : i32
      %19 = tpu.assume_multiple %18, 16 : i32
      %20 = arith.index_cast %19 : i32 to index
      %c0 = arith.constant 0 : index
      %21 = vector.load %arg2[%20, %c0] : memref<16x128xf32, #tpu.memory_space<vmem>>, vector<16x128xf32>
      %22 = arith.index_cast %19 : i32 to index
      %c0_11 = arith.constant 0 : index
      %23 = vector.load %arg3[%22, %c0_11] : memref<16x128xf32, #tpu.memory_space<vmem>>, vector<16x128xf32>
      %24 = arith.subf %21, %23 : vector<16x128xf32>
      %25 = tpu.iota {dimensions = array<i32: 0>} : vector<16x128xi32>
      %c16_i32_12 = arith.constant 16 : i32
      %26 = arith.muli %17, %c16_i32_12 : i32
      %27 = arith.addi %5, %26 : i32
      %28 = vector.broadcast %27 : i32 to vector<16x128xi32>
      %29 = arith.addi %25, %28 : vector<16x128xi32>
      %c16_i32_13 = arith.constant 16 : i32
      %30 = vector.broadcast %c16_i32_13 : i32 to vector<16x128xi32>
      %31 = arith.cmpi slt, %29, %30 : vector<16x128xi32>
      %cst = arith.constant 0.000000e+00 : f32
      %32 = vector.broadcast %cst : f32 to vector<16x128xf32>
      %33 = arith.select %31, %24, %32 : vector<16x128xi1>, vector<16x128xf32>
      %34 = arith.mulf %33, %33 : vector<16x128xf32>
      %c0_14 = arith.constant 0 : index
      %c0_15 = arith.constant 0 : index
      %35 = vector.load %arg5[%c0_14, %c0_15] : memref<8x128xf32, #tpu.memory_space<vmem>>, vector<8x128xf32>
      %36 = vector.shape_cast %34 : vector<16x128xf32> to vector<2x8x128xf32>
      %cst_16 = arith.constant dense<0.000000e+00> : vector<8x128xf32>
      %37 = vector.multi_reduction <add>, %36, %cst_16 [0] : vector<2x8x128xf32> to vector<8x128xf32>
      %38 = arith.addf %35, %37 : vector<8x128xf32>
      %c0_17 = arith.constant 0 : index
      %c0_18 = arith.constant 0 : index
      %39 = vector.load %arg5[%c0_17, %c0_18] : memref<8x128xf32, #tpu.memory_space<vmem>>, vector<8x128xf32>
      tpu.vector_store %arg5[%c0_17, %c0_18], %38 {strides = array<i32>} : memref<8x128xf32, #tpu.memory_space<vmem>>, vector<8x128xf32>,
      %c1_i32_19 = arith.constant 1 : i32
    } else {
    }
    %c0_i32_5 = arith.constant 0 : i32
    %13 = arith.cmpi eq, %arg1, %c0_i32_5 : i32
    %14 = arith.extui %13 : i1 to i32
    %c0_i32_6 = arith.constant 0 : i32
    %15 = arith.cmpi ne, %14, %c0_i32_6 : i32
    scf.if %15 {
      %c0 = arith.constant 0 : index
      %c0_7 = arith.constant 0 : index
      %16 = vector.load %arg5[%c0, %c0_7] : memref<8x128xf32, #tpu.memory_space<vmem>>, vector<8x128xf32>
      %c0_8 = arith.constant 0 : index
      %c0_9 = arith.constant 0 : index
      %c0_10 = arith.constant 0 : index
      %17 = vector.load %arg4[%c0_8, %c0_9, %c0_10] : memref<1x8x128xf32, #tpu.memory_space<vmem>>, vector<1x8x128xf32>
      %18 = vector.shape_cast %17 : vector<1x8x128xf32> to vector<8x128xf32>
      %19 = vector.shape_cast %16 : vector<8x128xf32> to vector<1x8x128xf32>
      tpu.vector_store %arg4[%c0_8, %c0_9, %c0_10], %19 {strides = array<i32>} : memref<1x8x128xf32, #tpu.memory_space<vmem>>, vector<1x8x128xf32>,
    } else {
    }
    return
  }
  func.func @transform_0(%arg0: i32, %arg1: i32) -> (i32, i32) {
    %c1_i32 = arith.constant 1 : i32
    %0 = arith.muli %arg0, %c1_i32 : i32
    %1 = arith.addi %0, %arg1 : i32
    %c0_i32 = arith.constant 0 : i32
    %2 = arith.minsi %1, %c0_i32 : i32
    %c0_i32_0 = arith.constant 0 : i32
    %c0_i32_1 = arith.constant 0 : i32
    return %2, %c0_i32_0 : i32, i32
  }
  func.func @transform_1(%arg0: i32, %arg1: i32) -> (i32, i32) {
    %c1_i32 = arith.constant 1 : i32
    %0 = arith.muli %arg0, %c1_i32 : i32
    %1 = arith.addi %0, %arg1 : i32
    %c0_i32 = arith.constant 0 : i32
    %2 = arith.minsi %1, %c0_i32 : i32
    %c0_i32_0 = arith.constant 0 : i32
    %c0_i32_1 = arith.constant 0 : i32
    return %2, %c0_i32_0 : i32, i32
  }
  func.func @transform_2(%arg0: i32, %arg1: i32) -> (i32, i32, i32) {
    %c0_i32 = arith.constant 0 : i32
    %c0_i32_0 = arith.constant 0 : i32
    %c0_i32_1 = arith.constant 0 : i32
    return %arg0, %c0_i32, %c0_i32_0 : i32, i32, i32
  }
}

</mosaic_0001>

<bundles_post_ra>
// kernel: tpu_custom_call.1
= control target key start
LH: loop header
LB: loop body
LE: loop exit
PB: predicated region body
PF: predicated region fallthrough
CT: control target
= control target key end

     0   :  { %7 = vsyncpa [#allocation4], 0  ;;  %s235_s0 = inlined_call_operand.hbm [shape: f32[16,128], index: 0, kind: input, shape index: {}]   ;;  %s236_s1 = inlined_call_operand.hbm [shape: f32[16,128], index: 1, kind: input, shape index: {}]   ;;  %s237_s2 = inlined_call_operand.hbm [shape: f32[1,8,128], index: 2, kind: output, shape index: {}]  }
   0x1   :  { %8 = vsyncpa [#allocation7], 0 }
   0x2   :  { %9 = vsyncpa [#allocation5], 0  ;;  %s206_s9 = smov [#allocation3]  }
   0x3   :  { %s21_s10 = sshll.u32 %s206_s9, 4  ;;  %s22_s10 = int_to_ptr.vmem [resolvable:$true] %s21_s10 }
   0x4   :  { %s148_s11 = scalar_lea.vmem %s22_s10, 256  ;;  %p153_p1 = scmp.lt.s32.totalorder %s22_s10, %s22_s10 }
   0x5   :  { %p149_p0 = scmp.ne.s32.totalorder %s22_s10, %s148_s11  ;;  %p154_p2 = scmp.lt.s32.totalorder %s148_s11, %s148_s11 }
   0x7   :  { %p155_p3 = por %p154_p2, %p153_p1 }
   0x9   :  { %p156_p4 = pnand %p155_p3, %p149_p0 }
   0xb   :  { %159 = shalt.err (!%p156_p4)
}
   0xc   :  { %s207_s12 = smov 128   ;;  %s208_s13 = smov 8  }
   0xd   :  { %27 = dma.hbm_to_vmem [thread:$0]  %s235_s0, 256, %s22_s10, [#allocation4], %s207_s12, %s207_s12, %s208_s13  }
   0xe   :  { %s209_s16 = smov [#allocation6]  }
   0xf   :  { %s39_s17 = sshll.u32 %s209_s16, 4  ;;  %s40_s17 = int_to_ptr.vmem [resolvable:$true] %s39_s17 }
  0x10   :  { %s168_s18 = scalar_lea.vmem %s40_s17, 256  ;;  %p173_p6 = scmp.lt.s32.totalorder %s40_s17, %s40_s17 }
  0x11   :  { %p169_p5 = scmp.ne.s32.totalorder %s40_s17, %s168_s18  ;;  %p174_p7 = scmp.lt.s32.totalorder %s168_s18, %s168_s18 }
  0x13   :  { %p175_p8 = por %p174_p7, %p173_p6 }
  0x15   :  { %p176_p9 = pnand %p175_p8, %p169_p5 }
  0x17   :  { %179 = shalt.err (!%p176_p9)
}
  0x18   :  { %45 = dma.hbm_to_vmem [thread:$0]  %s236_s1, 256, %s40_s17, [#allocation7], %s207_s12, %s207_s12, %s208_s13  }
  0x19   :  { %200 = dma.done.wait [#allocation4], 256  }
  0x1a   :  { %201 = vsyncadd [#allocation4], 4294967040 }
  0x1b   :  { %202 = dma.done.wait [#allocation7], 256  }
  0x1c   :  { %203 = vsyncadd [#allocation7], 4294967040  ;;  %v72_v0 = vld [vmem:[#allocation3] sm:$0xff]  ;;  %v73_v1 = vld [vmem:[#allocation3 + $0x8] sm:$0xff]  ;;  %s210_s0 = smov [#allocation8]  }
  0x1d   :  { %v74_v2 = vld [vmem:[#allocation6] sm:$0xff]  ;;  %v75_v3 = vld [vmem:[#allocation6 + $0x8] sm:$0xff]  ;;  %s121_s21 = sshll.u32 %s210_s0, 4  ;;  %s122_s21 = int_to_ptr.vmem [resolvable:$true] %s121_s21 }
  0x1e   :  { %v76_v4 = vsub.f32 %v72_v0, %v74_v2  ;;  %v77_v5 = vsub.f32 %v73_v1, %v75_v3  ;;  %s180_s22 = scalar_lea.vmem %s122_s21, 128  ;;  %p185_p11 = scmp.lt.s32.totalorder %s122_s21, %s122_s21 }
  0x1f   :  { %p181_p10 = scmp.ne.s32.totalorder %s122_s21, %s180_s22  ;;  %p186_p12 = scmp.lt.s32.totalorder %s180_s22, %s180_s22 }
  0x20   :  { %v78_v6 = vmul.f32 %v76_v4, %v76_v4  ;;  %v79_v7 = vmul.f32 %v77_v5, %v77_v5 }
  0x21   :  { %p187_p13 = por %p186_p12, %p185_p11 }
  0x22   :  { %v81_v8 = vadd.f32 %v79_v7, %v78_v6 }
  0x23   :  { %p188_p0 = pnand %p187_p13, %p181_p10 }
  0x24   :  { %114 = vst [vmem:[#allocation8] sm:$0xff] %v81_v8 }
  0x25   :  { %191 = shalt.err (!%p188_p0)
}
  0x26   :  { %124 = dma.vmem_to_hbm [thread:$0]  %s122_s21, 128, %s237_s2, [#allocation5]  }
  0x27   :  { %204 = dma.done.wait [#allocation5], 128  }
  0x28   :  { %205 = vsyncadd [#allocation5], 4294967168 }
  0x29   :  { %128 = vsyncpa [#allocation4], 1 }
  0x2a   :  { %129 = vsyncpa [#allocation7], 1 }
  0x2b   :  { %130 = vsyncpa [#allocation5], 1 }

</bundles_post_ra>
